<compile_context>
chip_gen: v6e
topology: v6e:2x2x1
jax: 0.10.0
libtpu: 0.0.40
codegen_flags: <defaults>
</compile_context>

<pallas_src>
import functools

import jax
import jax.numpy as jnp
import numpy as np
from jax.experimental import pallas as pl
from jax.experimental.pallas import tpu as pltpu

BN_EPS = 1e-5  # PyTorch BatchNorm default


def _round_up(x, m):
    return ((x + m - 1) // m) * m


def _head_kernel(feat_ref, wc_ref, gamma_ref, beta_ref, wall_ref, add_ref,
                 xmask_ref, pool_ref, fused_ref, scaled_ref, acc_ref,
                 *, inv_hw, scale):
    s = pl.program_id(0)

    @pl.when(s == 0)
    def _():
        acc_ref[...] = jnp.zeros_like(acc_ref)

    # 1) global average pooling: accumulate the spatial partial sum in f32.
    #    feat tile is (B, T, Cp) with C on the lane axis.
    acc_ref[...] += jnp.sum(feat_ref[...].astype(jnp.float32), axis=1)

    @pl.when(s == pl.num_programs(0) - 1)
    def _():
        pool = acc_ref[...] * inv_hw                          # (B, Cp) f32
        pool_ref[...] = pool

        # 2) bottleneck: 1x1 conv (no bias) == (B, Cp) @ (Cp, Ep) on the MXU.
        emb = jnp.dot(pool.astype(wc_ref.dtype), wc_ref[...],
                      preferred_element_type=jnp.float32)     # (B, Ep) f32

        # 3) MetaBNNorm, training mode: biased batch statistics over the batch
        #    dim, gamma affine, beta frozen at 0.  Kept in f32.
        mu = jnp.mean(emb, axis=0, keepdims=True)
        var = jnp.mean((emb - mu) ** 2, axis=0, keepdims=True)
        neck = ((emb - mu) * jax.lax.rsqrt(var + BN_EPS)
                * gamma_ref[...] + beta_ref[...])             # (B, Ep) f32

        # 4+5) one fused lane-dense GEMM for the three classifiers and the
        #      MetaParam center distance.
        #      W_all = [w1 | w2 | w3 | -2*centers], add = [0|0|0| ||c||^2],
        #      xmask = [0|0|0|1]  =>  fused = logits | squared distances.
        xn2 = jnp.sum(neck * neck, axis=1, keepdims=True)     # (B, 1)
        prod = jnp.dot(neck.astype(wall_ref.dtype), wall_ref[...],
                       preferred_element_type=jnp.float32)    # (B, NCP)
        fused = prod + add_ref[...] + xn2 * xmask_ref[...]
        fused_ref[...] = fused
        # pred_class_logits scaling fused into the epilogue (free under MXU slack).
        scaled_ref[...] = fused * scale


@functools.partial(jax.jit, static_argnames=("scale", "spatial_tile", "use_bf16"))
def meta_embedding_head_forward(features, params, scale=1.0, spatial_tile=64,
                                use_bf16=False):
    """features: (B, C, H, W) f32, NCHW. Returns the training-mode output dict."""
    B, C, H, W = features.shape
    HW = H * W

    # Layout plumbing: NCHW -> NHWC-flattened so C is the lane axis.
    feat = jnp.transpose(features, (0, 2, 3, 1)).reshape(B, HW, C)

    wc = params["conv_w"]          # (C, E)   pre-transposed 1x1 conv weight
    gamma = params["bn_gamma"]     # (1, E)
    beta = params["bn_beta"]       # (1, E)
    w1, w2, w3 = params["w1"], params["w2"], params["w3"]   # (E, NCi)
    ct = params["centers_t"]       # (E, NC1+NC2+NC3)

    E = wc.shape[1]
    nc1, nc2, nc3 = w1.shape[1], w2.shape[1], w3.shape[1]
    ncl = nc1 + nc2 + nc3
    nc = ct.shape[1]
    nall = ncl + nc

    # Lane-dense padded sizes.
    Cp = _round_up(C, 128)
    Ep = _round_up(E, 128)
    NCP = _round_up(nall, 128)

    # Spatial tile: multiple of 8 (sublane), pad HW with zero rows (exact for sum).
    T = _round_up(min(spatial_tile, _round_up(HW, 8)), 8)
    Sp = _round_up(HW, T)

    mm_dtype = jnp.bfloat16 if use_bf16 else jnp.float32

    feat_p = jnp.pad(feat, ((0, 0), (0, Sp - HW), (0, Cp - C))).astype(mm_dtype)
    wc_p = jnp.pad(wc, ((0, Cp - C), (0, Ep - E))).astype(mm_dtype)
    gamma_p = jnp.pad(gamma, ((0, 0), (0, Ep - E))).astype(jnp.float32)
    beta_p = jnp.pad(beta, ((0, 0), (0, Ep - E))).astype(jnp.float32)

    # Fused weight slab: classifiers + (-2 * centers), zero-padded.
    w_all = jnp.concatenate([w1, w2, w3, -2.0 * ct], axis=1)          # (E, nall)
    w_all_p = jnp.pad(w_all, ((0, Ep - E), (0, NCP - nall))).astype(mm_dtype)

    # Precomputed center squared norms + per-column mask for the x-norm term.
    cn2 = jnp.sum(ct * ct, axis=0, keepdims=True).astype(jnp.float32)  # (1, NC)
    add_vec = jnp.pad(
        jnp.concatenate([jnp.zeros((1, ncl), jnp.float32), cn2], axis=1),
        ((0, 0), (0, NCP - nall)))
    xmask = jnp.pad(
        jnp.concatenate([jnp.zeros((1, ncl), jnp.float32),
                         jnp.ones((1, nc), jnp.float32)], axis=1),
        ((0, 0), (0, NCP - nall)))

    # Explicit VMEM budget: double-buffered feature tile + resident weights,
    # outputs and accumulator, with 2x headroom (clamped to [32, 96] MiB).
    isz = jnp.dtype(mm_dtype).itemsize
    vmem_est = int(2 * B * T * Cp * isz
                   + (Cp * Ep + Ep * NCP) * isz
                   + (2 * Ep + 2 * NCP) * 4
                   + (B * Cp + 2 * B * NCP) * 4
                   + B * Cp * 4)
    vmem_limit = min(max(2 * vmem_est + (4 << 20), 32 << 20), 96 << 20)

    out_shapes = [
        jax.ShapeDtypeStruct((B, Cp), jnp.float32),   # pooled features (padded)
        jax.ShapeDtypeStruct((B, NCP), jnp.float32),  # [l1|l2|l3|dist] (padded)
        jax.ShapeDtypeStruct((B, NCP), jnp.float32),  # scale * fused   (padded)
    ]

    kernel = functools.partial(_head_kernel, inv_hw=1.0 / HW, scale=float(scale))

    pool_p, fused, scaled = pl.pallas_call(
        kernel,
        grid=(Sp // T,),
        in_specs=[
            pl.BlockSpec((B, T, Cp), lambda s: (0, s, 0)),   # feature tiles
            pl.BlockSpec((Cp, Ep), lambda s: (0, 0)),        # conv weight (resident)
            pl.BlockSpec((1, Ep), lambda s: (0, 0)),         # gamma
            pl.BlockSpec((1, Ep), lambda s: (0, 0)),         # beta
            pl.BlockSpec((Ep, NCP), lambda s: (0, 0)),       # fused weight slab
            pl.BlockSpec((1, NCP), lambda s: (0, 0)),        # ||c||^2 add vector
            pl.BlockSpec((1, NCP), lambda s: (0, 0)),        # x-norm column mask
        ],
        out_specs=[
            pl.BlockSpec((B, Cp), lambda s: (0, 0)),
            pl.BlockSpec((B, NCP), lambda s: (0, 0)),
            pl.BlockSpec((B, NCP), lambda s: (0, 0)),
        ],
        out_shape=out_shapes,
        scratch_shapes=[pltpu.VMEM((B, Cp), jnp.float32)],   # pooling accumulator
        compiler_params=pltpu.CompilerParams(
            dimension_semantics=("arbitrary",),
            vmem_limit_bytes=vmem_limit),
    )(feat_p, wc_p, gamma_p, beta_p, w_all_p, add_vec, xmask)

    pool = pool_p[:, :C]
    l1 = fused[:, :nc1]
    l2 = fused[:, nc1:nc1 + nc2]
    l3 = fused[:, nc1 + nc2:ncl]
    dist = fused[:, ncl:ncl + nc]

    return {
        "cls_outputs1": l1,            # any_softmax.Linear is identity
        "cls_outputs2": l2,
        "cls_outputs3": l3,
        "center_distmat": dist,
        "pred_class_logits1": scaled[:, :nc1],
        "pred_class_logits2": scaled[:, nc1:nc1 + nc2],
        "pred_class_logits3": scaled[:, nc1 + nc2:ncl],
        "features": pool,              # neck_feat == 'before' -> pool_feat[..., 0, 0]
    }


def _reference(features, params, scale=1.0):
    """Pure-JAX reference of the same forward, for verification."""
    pool = jnp.mean(features, axis=(2, 3))                       # (B, C)
    emb = pool @ params["conv_w"]                                # (B, E)
    mu = jnp.mean(emb, axis=0, keepdims=True)
    var = jnp.mean((emb - mu) ** 2, axis=0, keepdims=True)
    neck = (emb - mu) / jnp.sqrt(var + BN_EPS) * params["bn_gamma"] + params["bn_beta"]
    l1 = neck @ params["w1"]
    l2 = neck @ params["w2"]
    l3 = neck @ params["w3"]
    ct = params["centers_t"]
    dist = (jnp.sum(neck * neck, axis=1, keepdims=True)
            + jnp.sum(ct * ct, axis=0, keepdims=True)
            - 2.0 * neck @ ct)
    return {
        "cls_outputs1": l1, "cls_outputs2": l2, "cls_outputs3": l3,
        "center_distmat": dist,
        "pred_class_logits1": l1 * scale, "pred_class_logits2": l2 * scale,
        "pred_class_logits3": l3 * scale, "features": pool,
    }


def init_params(key, feat_dim, embedding_dim, nc1, nc2, nc3):
    kc, k1, k2, k3, kcen = jax.random.split(key, 5)
    # MetaConv2d 1x1: kaiming_normal (fan_out) like weights_init_kaiming
    std_conv = np.sqrt(2.0 / embedding_dim)
    conv_w = jax.random.normal(kc, (embedding_dim, feat_dim), jnp.float32) * std_conv
    return {
        "conv_w": conv_w.T,                                         # (C, E)
        "bn_gamma": jnp.ones((1, embedding_dim), jnp.float32),
        "bn_beta": jnp.zeros((1, embedding_dim), jnp.float32),      # bias_freeze=True
        # classifier weights: normal(std=0.01), stored transposed (E, NC)
        "w1": (jax.random.normal(k1, (nc1, embedding_dim), jnp.float32) * 0.01).T,
        "w2": (jax.random.normal(k2, (nc2, embedding_dim), jnp.float32) * 0.01).T,
        "w3": (jax.random.normal(k3, (nc3, embedding_dim), jnp.float32) * 0.01).T,
        "centers_t": (jax.random.normal(
            kcen, (nc1 + nc2 + nc3, embedding_dim), jnp.float32) * 0.01).T,
    }


if __name__ == "__main__":
    B, C, H, W = 8, 64, 8, 8
    EMB = 32
    NC1, NC2, NC3 = 16, 24, 20
    SCALE = 16.0

    key = jax.random.PRNGKey(0)
    kx, kp = jax.random.split(key)
    features = jax.random.normal(kx, (B, C, H, W), jnp.float32)
    params = init_params(kp, C, EMB, NC1, NC2, NC3)

    ref = _reference(features, params, scale=SCALE)

    # f32 path, multi-step spatial pipeline (HW=64, tile=16 -> 4 grid steps).
    out = meta_embedding_head_forward(features, params, scale=SCALE,
                                      spatial_tile=16, use_bf16=False)
    out = jax.tree_util.tree_map(jax.block_until_ready, out)
    for k in ref:
        np.testing.assert_allclose(np.asarray(out[k]), np.asarray(ref[k]),
                                   rtol=1e-4, atol=1e-4)

    # bf16 matmul path (v6e/v7x-style): f32 stats/accumulation, loose tolerance.
    out_bf = meta_embedding_head_forward(features, params, scale=SCALE,
                                         spatial_tile=16, use_bf16=True)
    out_bf = jax.tree_util.tree_map(jax.block_until_ready, out_bf)
    for k in ref:
        np.testing.assert_allclose(np.asarray(out_bf[k]), np.asarray(ref[k]),
                                   rtol=5e-2, atol=3e-2)

    print("KERNEL_OK")
</pallas_src>

<mosaic_0001>
module attributes {stable_mosaic.version = 11 : i64} {
  func.func @_head_kernel(%arg0: i32, %arg1: memref<8x16x128xf32, #tpu.memory_space<vmem>>, %arg2: memref<128x128xf32, #tpu.memory_space<vmem>>, %arg3: memref<1x128xf32, #tpu.memory_space<vmem>>, %arg4: memref<1x128xf32, #tpu.memory_space<vmem>>, %arg5: memref<128x128xf32, #tpu.memory_space<vmem>>, %arg6: memref<1x128xf32, #tpu.memory_space<vmem>>, %arg7: memref<1x128xf32, #tpu.memory_space<vmem>>, %arg8: memref<8x128xf32, #tpu.memory_space<vmem>>, %arg9: memref<8x128xf32, #tpu.memory_space<vmem>>, %arg10: memref<8x128xf32, #tpu.memory_space<vmem>>, %arg11: memref<8x128xf32, #tpu.memory_space<vmem>>) attributes {dimension_semantics = [#tpu.dimension_semantics<arbitrary>], iteration_bounds = array<i64: 4>, scalar_prefetch = 0 : i64, scratch_operands = 1 : i64, tpu.core_type = #tpu.core_type<tc>, window_params = [{transform_indices = @transform_0, window_bounds = array<i64: 8, 16, 128>}, {pipeline_mode = #tpu.pipeline_mode<synchronous>, transform_indices = @transform_1, window_bounds = array<i64: 128, 128>}, {pipeline_mode = #tpu.pipeline_mode<synchronous>, transform_indices = @transform_2, window_bounds = array<i64: 1, 128>}, {pipeline_mode = #tpu.pipeline_mode<synchronous>, transform_indices = @transform_3, window_bounds = array<i64: 1, 128>}, {pipeline_mode = #tpu.pipeline_mode<synchronous>, transform_indices = @transform_4, window_bounds = array<i64: 128, 128>}, {pipeline_mode = #tpu.pipeline_mode<synchronous>, transform_indices = @transform_5, window_bounds = array<i64: 1, 128>}, {pipeline_mode = #tpu.pipeline_mode<synchronous>, transform_indices = @transform_6, window_bounds = array<i64: 1, 128>}, {pipeline_mode = #tpu.pipeline_mode<synchronous>, transform_indices = @transform_7, window_bounds = array<i64: 8, 128>}, {pipeline_mode = #tpu.pipeline_mode<synchronous>, transform_indices = @transform_8, window_bounds = array<i64: 8, 128>}, {pipeline_mode = #tpu.pipeline_mode<synchronous>, transform_indices = @transform_9, window_bounds = array<i64: 8, 128>}]} {
    %c0_i32 = arith.constant 0 : i32
    %0 = arith.cmpi eq, %arg0, %c0_i32 : i32
    %1 = arith.extui %0 : i1 to i32
    %c0_i32_0 = arith.constant 0 : i32
    %2 = arith.cmpi ne, %1, %c0_i32_0 : i32
    scf.if %2 {
      %cst_8 = arith.constant 0.000000e+00 : f32
      %11 = vector.broadcast %cst_8 : f32 to vector<8x128xf32>
      %c0_9 = arith.constant 0 : index
      %c0_10 = arith.constant 0 : index
      %12 = vector.load %arg11[%c0_9, %c0_10] : memref<8x128xf32, #tpu.memory_space<vmem>>, vector<8x128xf32>
      tpu.vector_store %arg11[%c0_9, %c0_10], %11 {strides = array<i32>} : memref<8x128xf32, #tpu.memory_space<vmem>>, vector<8x128xf32>,
    } else {
    }
    %c0 = arith.constant 0 : index
    %c0_1 = arith.constant 0 : index
    %3 = vector.load %arg11[%c0, %c0_1] : memref<8x128xf32, #tpu.memory_space<vmem>>, vector<8x128xf32>
    %c0_2 = arith.constant 0 : index
    %c0_3 = arith.constant 0 : index
    %c0_4 = arith.constant 0 : index
    %4 = vector.load %arg1[%c0_2, %c0_3, %c0_4] : memref<8x16x128xf32, #tpu.memory_space<vmem>>, vector<8x16x128xf32>
    %cst = arith.constant dense<0.000000e+00> : vector<8x128xf32>
    %5 = vector.multi_reduction <add>, %4, %cst [1] : vector<8x16x128xf32> to vector<8x128xf32>
    %6 = arith.addf %3, %5 : vector<8x128xf32>
    %c0_5 = arith.constant 0 : index
    %c0_6 = arith.constant 0 : index
    %7 = vector.load %arg11[%c0_5, %c0_6] : memref<8x128xf32, #tpu.memory_space<vmem>>, vector<8x128xf32>
    tpu.vector_store %arg11[%c0_5, %c0_6], %6 {strides = array<i32>} : memref<8x128xf32, #tpu.memory_space<vmem>>, vector<8x128xf32>,
    %c3_i32 = arith.constant 3 : i32
    %8 = arith.cmpi eq, %arg0, %c3_i32 : i32
    %9 = arith.extui %8 : i1 to i32
    %c0_i32_7 = arith.constant 0 : i32
    %10 = arith.cmpi ne, %9, %c0_i32_7 : i32
    scf.if %10 {
      %c0_8 = arith.constant 0 : index
      %c0_9 = arith.constant 0 : index
      %11 = vector.load %arg11[%c0_8, %c0_9] : memref<8x128xf32, #tpu.memory_space<vmem>>, vector<8x128xf32>
      %cst_10 = arith.constant 1.562500e-02 : f32
      %12 = vector.broadcast %cst_10 : f32 to vector<8x128xf32>
      %13 = arith.mulf %11, %12 : vector<8x128xf32>
      %c0_11 = arith.constant 0 : index
      %c0_12 = arith.constant 0 : index
      %14 = vector.load %arg8[%c0_11, %c0_12] : memref<8x128xf32, #tpu.memory_space<vmem>>, vector<8x128xf32>
      tpu.vector_store %arg8[%c0_11, %c0_12], %13 {strides = array<i32>} : memref<8x128xf32, #tpu.memory_space<vmem>>, vector<8x128xf32>,
      %c0_13 = arith.constant 0 : index
      %c0_14 = arith.constant 0 : index
      %15 = vector.load %arg2[%c0_13, %c0_14] : memref<128x128xf32, #tpu.memory_space<vmem>>, vector<128x128xf32>
      %cst_15 = arith.constant dense<0.000000e+00> : vector<8x128xf32>
      %16 = tpu.matmul %13, %15, %cst_15 {dimension_numbers = #tpu.dot_dimension_numbers<[1], [0], [0], [1], [0, 0, 1, 1], [], []>} : vector<8x128xf32>, vector<128x128xf32>, vector<8x128xf32> -> vector<8x128xf32>
      %cst_16 = arith.constant dense<0.000000e+00> : vector<128xf32>
      %17 = vector.multi_reduction <add>, %16, %cst_16 [0] : vector<8x128xf32> to vector<128xf32>
      %18 = vector.shape_cast %17 : vector<128xf32> to vector<1x128xf32>
      %cst_17 = arith.constant 8.000000e+00 : f32
      %19 = vector.broadcast %cst_17 : f32 to vector<1x128xf32>
      %20 = arith.divf %18, %19 : vector<1x128xf32>
      %21 = vector.broadcast %20 : vector<1x128xf32> to vector<8x128xf32>
      %22 = arith.subf %16, %21 : vector<8x128xf32>
      %23 = arith.mulf %22, %22 : vector<8x128xf32>
      %cst_18 = arith.constant dense<0.000000e+00> : vector<128xf32>
      %24 = vector.multi_reduction <add>, %23, %cst_18 [0] : vector<8x128xf32> to vector<128xf32>
      %25 = vector.shape_cast %24 : vector<128xf32> to vector<1x128xf32>
      %cst_19 = arith.constant 8.000000e+00 : f32
      %26 = vector.broadcast %cst_19 : f32 to vector<1x128xf32>
      %27 = arith.divf %25, %26 : vector<1x128xf32>
      %28 = vector.broadcast %20 : vector<1x128xf32> to vector<8x128xf32>
      %29 = arith.subf %16, %28 : vector<8x128xf32>
      %cst_20 = arith.constant 9.99999974E-6 : f32
      %30 = vector.broadcast %cst_20 : f32 to vector<1x128xf32>
      %31 = arith.addf %27, %30 : vector<1x128xf32>
      %32 = math.rsqrt %31 : vector<1x128xf32>
      %33 = vector.broadcast %32 : vector<1x128xf32> to vector<8x128xf32>
      %34 = arith.mulf %29, %33 : vector<8x128xf32>
      %c0_21 = arith.constant 0 : index
      %c0_22 = arith.constant 0 : index
      %35 = vector.load %arg3[%c0_21, %c0_22] : memref<1x128xf32, #tpu.memory_space<vmem>>, vector<1x128xf32>
      %36 = vector.broadcast %35 : vector<1x128xf32> to vector<8x128xf32>
      %37 = arith.mulf %34, %36 : vector<8x128xf32>
      %c0_23 = arith.constant 0 : index
      %c0_24 = arith.constant 0 : index
      %38 = vector.load %arg4[%c0_23, %c0_24] : memref<1x128xf32, #tpu.memory_space<vmem>>, vector<1x128xf32>
      %39 = vector.broadcast %38 : vector<1x128xf32> to vector<8x128xf32>
      %40 = arith.addf %37, %39 : vector<8x128xf32>
      %41 = arith.mulf %40, %40 : vector<8x128xf32>
      %cst_25 = arith.constant dense<0.000000e+00> : vector<8xf32>
      %42 = vector.multi_reduction <add>, %41, %cst_25 [1] : vector<8x128xf32> to vector<8xf32>
      %43 = vector.shape_cast %42 : vector<8xf32> to vector<8x1xf32>
      %c0_26 = arith.constant 0 : index
      %c0_27 = arith.constant 0 : index
      %44 = vector.load %arg5[%c0_26, %c0_27] : memref<128x128xf32, #tpu.memory_space<vmem>>, vector<128x128xf32>
      %cst_28 = arith.constant dense<0.000000e+00> : vector<8x128xf32>
      %45 = tpu.matmul %40, %44, %cst_28 {dimension_numbers = #tpu.dot_dimension_numbers<[1], [0], [0], [1], [0, 0, 1, 1], [], []>} : vector<8x128xf32>, vector<128x128xf32>, vector<8x128xf32> -> vector<8x128xf32>
      %c0_29 = arith.constant 0 : index
      %c0_30 = arith.constant 0 : index
      %46 = vector.load %arg6[%c0_29, %c0_30] : memref<1x128xf32, #tpu.memory_space<vmem>>, vector<1x128xf32>
      %47 = vector.broadcast %46 : vector<1x128xf32> to vector<8x128xf32>
      %48 = arith.addf %45, %47 : vector<8x128xf32>
      %c0_31 = arith.constant 0 : index
      %c0_32 = arith.constant 0 : index
      %49 = vector.load %arg7[%c0_31, %c0_32] : memref<1x128xf32, #tpu.memory_space<vmem>>, vector<1x128xf32>
      %50 = vector.broadcast %43 : vector<8x1xf32> to vector<8x128xf32>
      %51 = vector.broadcast %49 : vector<1x128xf32> to vector<8x128xf32>
      %52 = arith.mulf %50, %51 : vector<8x128xf32>
      %53 = arith.addf %48, %52 : vector<8x128xf32>
      %c0_33 = arith.constant 0 : index
      %c0_34 = arith.constant 0 : index
      %54 = vector.load %arg9[%c0_33, %c0_34] : memref<8x128xf32, #tpu.memory_space<vmem>>, vector<8x128xf32>
      tpu.vector_store %arg9[%c0_33, %c0_34], %53 {strides = array<i32>} : memref<8x128xf32, #tpu.memory_space<vmem>>, vector<8x128xf32>,
      %cst_35 = arith.constant 1.600000e+01 : f32
      %55 = vector.broadcast %cst_35 : f32 to vector<8x128xf32>
      %56 = arith.mulf %53, %55 : vector<8x128xf32>
      %c0_36 = arith.constant 0 : index
      %c0_37 = arith.constant 0 : index
      %57 = vector.load %arg10[%c0_36, %c0_37] : memref<8x128xf32, #tpu.memory_space<vmem>>, vector<8x128xf32>
      tpu.vector_store %arg10[%c0_36, %c0_37], %56 {strides = array<i32>} : memref<8x128xf32, #tpu.memory_space<vmem>>, vector<8x128xf32>,
    } else {
    }
    return
  }
  func.func @transform_0(%arg0: i32) -> (i32, i32, i32) {
    %c0_i32 = arith.constant 0 : i32
    %c0_i32_0 = arith.constant 0 : i32
    %c0_i32_1 = arith.constant 0 : i32
    return %c0_i32, %arg0, %c0_i32_0 : i32, i32, i32
  }
  func.func @transform_1(%arg0: i32) -> (i32, i32) {
    %c0_i32 = arith.constant 0 : i32
    %c0_i32_0 = arith.constant 0 : i32
    %c0_i32_1 = arith.constant 0 : i32
    return %c0_i32, %c0_i32_0 : i32, i32
  }
  func.func @transform_2(%arg0: i32) -> (i32, i32) {
    %c0_i32 = arith.constant 0 : i32
    %c0_i32_0 = arith.constant 0 : i32
    %c0_i32_1 = arith.constant 0 : i32
    return %c0_i32, %c0_i32_0 : i32, i32
  }
  func.func @transform_3(%arg0: i32) -> (i32, i32) {
    %c0_i32 = arith.constant 0 : i32
    %c0_i32_0 = arith.constant 0 : i32
    %c0_i32_1 = arith.constant 0 : i32
    return %c0_i32, %c0_i32_0 : i32, i32
  }
  func.func @transform_4(%arg0: i32) -> (i32, i32) {
    %c0_i32 = arith.constant 0 : i32
    %c0_i32_0 = arith.constant 0 : i32
    %c0_i32_1 = arith.constant 0 : i32
    return %c0_i32, %c0_i32_0 : i32, i32
  }
  func.func @transform_5(%arg0: i32) -> (i32, i32) {
    %c0_i32 = arith.constant 0 : i32
    %c0_i32_0 = arith.constant 0 : i32
    %c0_i32_1 = arith.constant 0 : i32
    return %c0_i32, %c0_i32_0 : i32, i32
  }
  func.func @transform_6(%arg0: i32) -> (i32, i32) {
    %c0_i32 = arith.constant 0 : i32
    %c0_i32_0 = arith.constant 0 : i32
    %c0_i32_1 = arith.constant 0 : i32
    return %c0_i32, %c0_i32_0 : i32, i32
  }
  func.func @transform_7(%arg0: i32) -> (i32, i32) {
    %c0_i32 = arith.constant 0 : i32
    %c0_i32_0 = arith.constant 0 : i32
    %c0_i32_1 = arith.constant 0 : i32
    return %c0_i32, %c0_i32_0 : i32, i32
  }
  func.func @transform_8(%arg0: i32) -> (i32, i32) {
    %c0_i32 = arith.constant 0 : i32
    %c0_i32_0 = arith.constant 0 : i32
    %c0_i32_1 = arith.constant 0 : i32
    return %c0_i32, %c0_i32_0 : i32, i32
  }
  func.func @transform_9(%arg0: i32) -> (i32, i32) {
    %c0_i32 = arith.constant 0 : i32
    %c0_i32_0 = arith.constant 0 : i32
    %c0_i32_1 = arith.constant 0 : i32
    return %c0_i32, %c0_i32_0 : i32, i32
  }
}

</mosaic_0001>

<bundles_post_ra>
// kernel: meta_embedding_head_forward.1
= control target key start
LH: loop header
LB: loop body
LE: loop exit
PB: predicated region body
PF: predicated region fallthrough
CT: control target
= control target key end

     0   :  { %15 = vsyncpa [#allocation5], 0  ;;  %s1080_s30 = smov 0   ;;  %s1082_s10 = smov 0   ;;  %s1312_s0 = inlined_call_operand.vmem [shape: f32[8,64,128], index: 0, kind: input, shape index: {}]   ;;  %s1313_s1 = inlined_call_operand.vmem [shape: f32[128,128], index: 1, kind: input, shape index: {}]   ;;  %s1314_s2 = inlined_call_operand.vmem [shape: f32[1,128], index: 2, kind: input, shape index: {}]   ;;  %s1315_s3 = inlined_call_operand.vmem [shape: f32[1,128], index: 3, kind: input, shape index: {}]   ;;  %s1316_s4 = inlined_call_operand.vmem [shape: f32[128,128], index: 4, kind: input, shape index: {}]   ;;  %s1317_s5 = inlined_call_operand.vmem [shape: f32[1,128], index: 5, kind: input, shape index: {}]   ;;  %s1318_s6 = inlined_call_operand.vmem [shape: f32[1,128], index: 6, kind: input, shape index: {}]   ;;  %s1319_s7 = inlined_call_operand.hbm [shape: f32[8,128], index: 7, kind: output, shape index: {0}]   ;;  %s1320_s8 = inlined_call_operand.vmem [shape: f32[8,128], index: 8, kind: output, shape index: {1}]   ;;  %s1321_s9 = inlined_call_operand.vmem [shape: f32[8,128], index: 9, kind: output, shape index: {2}]  }
   0x1   :  { %s1084_s11 = smov 0  }
   0x2 LB: > { %s1096_s12 = sadd.s32 4294967295, %s1024_s11   ;;  %s1099_s13 = sadd.s32 1, %s1024_s11   ;;  %s1024_s11 = sphi %s1084_s11, %s1324_s11   ;;  %s1020_s10 = sphi %s1082_s10, %s1323_s10   ;;  %s1016_s30 = sphi %s1080_s30, %s1322_s30  }
   0x3   : > { %s25_s14 = ssub.s32 %s1024_s11, %s1099_s13  ;;  %s28_s15 = sadd.s32 1, %s1020_s10 }
   0x4   : > { %p26_p0 = scmp.eq.s32.totalorder %s25_s14, 0  ;;  %p35_p1 = scmp.ne.s32.totalorder %s1020_s10, %s1016_s30 }
   0x5   : > { %p36_p2 = scmp.eq.s32.totalorder %s1024_s11, 0  ;;  %p817_p4 = scmp.ge.s32.totalorder %s1024_s11, 4 }
   0x6   : > { %s1108_s16 = scalar_select %p26_p0, %s1020_s10, %s28_s15  }
   0x7   : > { %p37_p3 = por %p36_p2, %p35_p1  ;;  %268 = sbr.rel (%p817_p4) target bundleno = 24 (0x18), region = 40 }
   0xc   : > { %271 = sbr.rel (!%p37_p3) target bundleno = 24 (0x18), region = 44  ;;  %s273_s17 = sand.u32 (%p37_p3), 1, %s1020_s10  }
   0xd   : > { %s833_s18 = sshll.u32 (%p37_p3), %s1024_s11, 4  ;;  %s818_s19 = sshll.u32 (%p37_p3), %s273_s17, 7 }
   0xe   : > { %s1116_s22 = scalar_lea.vmem (%p37_p3), %s1312_s0, %s833_s18  ;;  %s275_s23 = scalar_lea.vmem (%p37_p3), [#allocation3], %s818_s19 }
   0xf   : > { %v337_v0 = vld [vmem:[%s1116_s22] sm:$0xff] (%p37_p3)  ;;  %v339_v1 = vld [vmem:[%s1116_s22 + $0x8] sm:$0xff] (%p37_p3) }
  0x10   : > { %v341_v2 = vld [vmem:[%s1116_s22 + $0x40] sm:$0xff] (%p37_p3)  ;;  %338 = vst [vmem:[%s275_s23] sm:$0xff] (%p37_p3), %v337_v0  ;;  %340 = vst [vmem:[%s275_s23 + $0x8] sm:$0xff] (%p37_p3), %v339_v1  ;;  %v343_v3 = vld [vmem:[%s1116_s22 + $0x48] sm:$0xff] (%p37_p3) }
  0x11   : > { %342 = vst [vmem:[%s275_s23 + $0x10] sm:$0xff] %v341_v2  ;;  %v345_v4 = vld [vmem:[%s1116_s22 + $0x80] sm:$0xff]  ;;  %v347_v5 = vld [vmem:[%s1116_s22 + $0x88] sm:$0xff]  ;;  %344 = vst [vmem:[%s275_s23 + $0x18] sm:$0xff] %v343_v3 }
  0x12   : > { %346 = vst [vmem:[%s275_s23 + $0x20] sm:$0xff] %v345_v4  ;;  %348 = vst [vmem:[%s275_s23 + $0x28] sm:$0xff] %v347_v5  ;;  %v349_v6 = vld [vmem:[%s1116_s22 + $0xc0] sm:$0xff]  ;;  %v351_v7 = vld [vmem:[%s1116_s22 + $0xc8] sm:$0xff] }
  0x13   : > { %v353_v8 = vld [vmem:[%s1116_s22 + $0x100] sm:$0xff]  ;;  %350 = vst [vmem:[%s275_s23 + $0x30] sm:$0xff] %v349_v6  ;;  %352 = vst [vmem:[%s275_s23 + $0x38] sm:$0xff] %v351_v7  ;;  %v355_v9 = vld [vmem:[%s1116_s22 + $0x108] sm:$0xff] }
  0x14   : > { %354 = vst [vmem:[%s275_s23 + $0x40] sm:$0xff] %v353_v8  ;;  %v357_v10 = vld [vmem:[%s1116_s22 + $0x140] sm:$0xff]  ;;  %v359_v11 = vld [vmem:[%s1116_s22 + $0x148] sm:$0xff]  ;;  %356 = vst [vmem:[%s275_s23 + $0x48] sm:$0xff] %v355_v9 }
  0x15   : > { %358 = vst [vmem:[%s275_s23 + $0x50] sm:$0xff] %v357_v10  ;;  %360 = vst [vmem:[%s275_s23 + $0x58] sm:$0xff] %v359_v11  ;;  %v361_v12 = vld [vmem:[%s1116_s22 + $0x180] sm:$0xff]  ;;  %v363_v13 = vld [vmem:[%s1116_s22 + $0x188] sm:$0xff] }
  0x16   : > { %v365_v14 = vld [vmem:[%s1116_s22 + $0x1c0] sm:$0xff]  ;;  %362 = vst [vmem:[%s275_s23 + $0x60] sm:$0xff] %v361_v12  ;;  %364 = vst [vmem:[%s275_s23 + $0x68] sm:$0xff] %v363_v13  ;;  %v367_v15 = vld [vmem:[%s1116_s22 + $0x1c8] sm:$0xff] }
  0x17   : > { %366 = vst [vmem:[%s275_s23 + $0x70] sm:$0xff] %v365_v14  ;;  %368 = vst [vmem:[%s275_s23 + $0x78] sm:$0xff] %v367_v15 }
  0x18 PF: > { %p821_p5 = scmp.ge.s32.totalorder %s1024_s11, 1  ;;  %p373_p6 = scmp.lt.s32.totalorder %s1024_s11, 5 }
  0x1a   : > { %p374_p7 = pnand %p821_p5, %p373_p6 }
  0x1b   : > { %s380_s24 = sand.u32 (!%p374_p7), 1, %s1016_s30   ;;  %p823_p8 = scmp.ne.s32.totalorder (!%p374_p7), %s1096_s12, 0 }
  0x1c   : > { %377 = sbr.rel (%p374_p7) target bundleno = 561 (0x231), region = 82  ;;  %s822_s25 = sshll.u32 (!%p374_p7), %s380_s24, 7 }
  0x1d   : > { %s382_s26 = scalar_lea.vmem (!%p374_p7), [#allocation3], %s822_s25 }
  0x21   : > { %414 = sbr.rel (%p823_p8) target bundleno = 40 (0x28), region = 90 }
  0x26   : > { %v1026_v16 = vmov 0.0  }
  0x27   : > { %415 = vst [vmem:[#allocation2] sm:$0xff] %v1026_v16 }
  0x28 PF: > { %v417_v17 = vld [vmem:[%s382_s26] sm:$0xff]  ;;  %v418_v18 = vld [vmem:[%s382_s26 + $0x8] sm:$0xff]  ;;  %v419_v19 = vld [vmem:[%s382_s26 + $0x10] sm:$0xff]  ;;  %vm497_vm0 = vcmask 1041409   ;;  %vm499_vm1 = vcmask 1042434   ;;  %vm501_vm2 = vcmask 1043459  }
  0x29   : > { %v420_v20 = vld [vmem:[%s382_s26 + $0x18] sm:$0xff]  ;;  %v421_v21 = vld [vmem:[%s382_s26 + $0x20] sm:$0xff]  ;;  %v433_v22 = vadd.f32 %v418_v18, %v417_v17  ;;  %v422_v23 = vld [vmem:[%s382_s26 + $0x28] sm:$0xff]  ;;  %vm503_vm3 = vcmask 1044484   ;;  %vm505_vm4 = vcmask 1045509   ;;  %vm507_vm5 = vcmask 1046534  }
  0x2a   : > { %v423_v24 = vld [vmem:[%s382_s26 + $0x30] sm:$0xff]  ;;  %v424_v25 = vld [vmem:[%s382_s26 + $0x38] sm:$0xff]  ;;  %v440_v26 = vadd.f32 %v420_v20, %v419_v19  ;;  %v425_v27 = vld [vmem:[%s382_s26 + $0x40] sm:$0xff]  ;;  %v447_v31 = vadd.f32 %v422_v23, %v421_v21  ;;  %vm509_vm6 = vcmask 1047559   ;;  %p824_p9 = scmp.ne.s32.totalorder %s1096_s12, 3 }
  0x2b   : > { %v426_v28 = vld [vmem:[%s382_s26 + $0x48] sm:$0xff]  ;;  %v427_v29 = vld [vmem:[%s382_s26 + $0x50] sm:$0xff]  ;;  %v434_v30 = vrot.slane %v433_v22, 4  ;;  %v454_v32 = vadd.f32 %v424_v25, %v423_v24  ;;  %v428_v33 = vld [vmem:[%s382_s26 + $0x58] sm:$0xff] }
  0x2c   : > { %v429_v34 = vld [vmem:[%s382_s26 + $0x60] sm:$0xff]  ;;  %v430_v35 = vld [vmem:[%s382_s26 + $0x68] sm:$0xff]  ;;  %v441_v36 = vrot.slane %v440_v26, 4  ;;  %v461_v37 = vadd.f32 %v426_v28, %v425_v27  ;;  %v431_v38 = vld [vmem:[%s382_s26 + $0x70] sm:$0xff]  ;;  %v448_v41 = vrot.slane %v447_v31, 4  ;;  %v468_v43 = vadd.f32 %v428_v33, %v427_v29 }
  0x2d   : > { %v432_v39 = vld [vmem:[%s382_s26 + $0x78] sm:$0xff]  ;;  %v435_v40 = vadd.f32 %v434_v30, %v433_v22  ;;  %v455_v42 = vrot.slane %v454_v32, 4  ;;  %v475_v46 = vadd.f32 %v430_v35, %v429_v34 }
  0x2e   : > { %v442_v44 = vadd.f32 %v441_v36, %v440_v26  ;;  %v462_v45 = vrot.slane %v461_v37, 4  ;;  %v482_v47 = vadd.f32 %v432_v39, %v431_v38  ;;  %v449_v49 = vadd.f32 %v448_v41, %v447_v31  ;;  %v416_v29 = vld [vmem:[#allocation2] sm:$0xff] }
  0x2f   : > { %v436_v48 = vrot.slane %v435_v40, 2  ;;  %v456_v50 = vadd.f32 %v455_v42, %v454_v32  ;;  %v469_v51 = vrot.slane %v468_v43, 4  ;;  %v476_v54 = vrot.slane %v475_v46, 4 }
  0x30   : > { %v443_v52 = vrot.slane %v442_v44, 2  ;;  %v463_v53 = vadd.f32 %v462_v45, %v461_v37  ;;  %v483_v55 = vrot.slane %v482_v47, 4  ;;  %v450_v57 = vrot.slane %v449_v49, 2 }
  0x31   : > { %v437_v56 = vadd.f32 %v436_v48, %v435_v40  ;;  %v457_v58 = vrot.slane %v456_v50, 2  ;;  %v470_v59 = vadd.f32 %v469_v51, %v468_v43  ;;  %v477_v62 = vadd.f32 %v476_v54, %v475_v46 }
  0x32   : > { %v444_v60 = vadd.f32 %v443_v52, %v442_v44  ;;  %v464_v61 = vrot.slane %v463_v53, 2  ;;  %v484_v63 = vadd.f32 %v483_v55, %v482_v47  ;;  %v451_v1 = vadd.f32 %v450_v57, %v449_v49 }
  0x33   : > { %v438_v0 = vrot.slane %v437_v56, 1  ;;  %v458_v2 = vadd.f32 %v457_v58, %v456_v50  ;;  %v471_v3 = vrot.slane %v470_v59, 2  ;;  %v478_v6 = vrot.slane %v477_v62, 2 }
  0x34   : > { %v445_v4 = vrot.slane %v444_v60, 1  ;;  %v465_v5 = vadd.f32 %v464_v61, %v463_v53  ;;  %v485_v7 = vrot.slane %v484_v63, 2  ;;  %v452_v9 = vrot.slane %v451_v1, 1 }
  0x35   : > { %v439_v8 = vadd.f32 %v438_v0, %v437_v56  ;;  %v459_v10 = vrot.slane %v458_v2, 1  ;;  %v472_v11 = vadd.f32 %v471_v3, %v470_v59  ;;  %v479_v14 = vadd.f32 %v478_v6, %v477_v62 }
  0x36   : > { %v446_v12 = vadd.f32 %v445_v4, %v444_v60  ;;  %v466_v13 = vrot.slane %v465_v5, 1  ;;  %v486_v15 = vadd.f32 %v485_v7, %v484_v63  ;;  %v453_v16 = vadd.f32 %v452_v9, %v451_v1 }
  0x37   : > { %v460_v17 = vadd.f32 %v459_v10, %v458_v2  ;;  %v473_v18 = vrot.slane %v472_v11, 1  ;;  %v480_v20 = vrot.slane %v479_v14, 1 }
  0x38   : > { %v467_v19 = vadd.f32 %v466_v13, %v465_v5  ;;  %v487_v21 = vrot.slane %v486_v15, 1  ;;  %v498_v22 = vsel %vm497_vm0, %v446_v12, %v439_v8 }
  0x39   : > { %v474_v23 = vadd.f32 %v473_v18, %v472_v11  ;;  %v500_v24 = vsel %vm499_vm1, %v453_v16, %v498_v22  ;;  %v481_v25 = vadd.f32 %v480_v20, %v479_v14 }
  0x3a   : > { %v488_v26 = vadd.f32 %v487_v21, %v486_v15  ;;  %v502_v27 = vsel %vm501_vm2, %v460_v17, %v500_v24 }
  0x3b   : > { %v504_v28 = vsel %vm503_vm3, %v467_v19, %v502_v27 }
  0x3c   : > { %v506_v30 = vsel %vm505_vm4, %v474_v23, %v504_v28 }
  0x3d   : > { %v508_v31 = vsel %vm507_vm5, %v481_v25, %v506_v30  ;;  %517 = sbr.rel (%p824_p9) target bundleno = 546 (0x222), region = 94 }
  0x3e   : > { %v510_v32 = vsel %vm509_vm6, %v488_v26, %v508_v31 }
  0x3f   : > { %v512_v33 = vadd.f32 %v510_v32, %v416_v29 }
  0x41   : > { %513 = vst [vmem:[#allocation2] sm:$0xff] %v512_v33 }
  0x42   : > { %v536_v34 = vld [vmem:[%s1313_s1 + $0x78] sm:$0xff]  ;;  %v1027_v35 = vmov 0.0   ;;  %v535_v36 = vld [vmem:[%s1313_s1 + $0x70] sm:$0xff]  ;;  %vm1028_vm7 = vmmov 0   ;;  %v534_v37 = vld [vmem:[%s1313_s1 + $0x68] sm:$0xff] }
  0x43   : > { %868 = vmatprep.subr.mxu0 %v1027_v35  ;;  %900 = vmatprep.mubr.msk.f32.mxu0 %vm1028_vm7, %v1027_v35  ;;  %v533_v38 = vld [vmem:[%s1313_s1 + $0x60] sm:$0xff]  ;;  %v532_v41 = vld [vmem:[%s1313_s1 + $0x58] sm:$0xff]  ;;  %v531_v42 = vld [vmem:[%s1313_s1 + $0x50] sm:$0xff] }
  0x44   : > { %869 = vmatpush3.msra.mxu0 %v536_v34  ;;  %903 = vmatprep.subr.mxu1 %v1027_v35  ;;  %v530_v43 = vld [vmem:[%s1313_s1 + $0x48] sm:$0xff]  ;;  %v529_v44 = vld [vmem:[%s1313_s1 + $0x40] sm:$0xff]  ;;  %v528_v45 = vld [vmem:[%s1313_s1 + $0x38] sm:$0xff] }
  0x45   : > { %870 = vmatprep.subr.mxu0 %v1027_v35  ;;  %935 = vmatprep.mubr.msk.f32.mxu1 %vm1028_vm7, %v1027_v35  ;;  %v527_v46 = vld [vmem:[%s1313_s1 + $0x30] sm:$0xff]  ;;  %v526_v47 = vld [vmem:[%s1313_s1 + $0x28] sm:$0xff]  ;;  %v525_v48 = vld [vmem:[%s1313_s1 + $0x20] sm:$0xff] }
  0x46   : > { %871 = vmatpush3.msra.mxu0 %v535_v36  ;;  %v524_v49 = vld [vmem:[%s1313_s1 + $0x18] sm:$0xff]  ;;  %v523_v50 = vld [vmem:[%s1313_s1 + $0x10] sm:$0xff]  ;;  %v522_v51 = vld [vmem:[%s1313_s1 + $0x8] sm:$0xff] }
  0x47   : > { %872 = vmatprep.subr.mxu0 %v1027_v35  ;;  %v521_v52 = vld [vmem:[%s1313_s1] sm:$0xff]  ;;  %v661_v53 = vld [vmem:[%s1316_s4 + $0x78] sm:$0xff]  ;;  %v660_v54 = vld [vmem:[%s1316_s4 + $0x70] sm:$0xff] }
  0x48   : > { %v518_v39 = vld [vmem:[#allocation2] sm:$0xff]  ;;  %873 = vmatpush3.msra.mxu0 %v534_v37  ;;  %904 = vmatpush3.msra.mxu1 %v661_v53  ;;  %v659_v55 = vld [vmem:[%s1316_s4 + $0x68] sm:$0xff]  ;;  %v657_v57 = vld [vmem:[%s1316_s4 + $0x58] sm:$0xff] }
  0x49   : > { %v519_v40 = vmul.f32 0.015625, %v518_v39  ;;  %874 = vmatprep.subr.mxu0 %v1027_v35  ;;  %905 = vmatprep.subr.mxu1 %v1027_v35  ;;  %v658_v56 = vld [vmem:[%s1316_s4 + $0x60] sm:$0xff]  ;;  %v656_v58 = vld [vmem:[%s1316_s4 + $0x50] sm:$0xff]  ;;  %v655_v59 = vld [vmem:[%s1316_s4 + $0x48] sm:$0xff] }
  0x4a   : > { %875 = vmatpush3.msra.mxu0 %v533_v38  ;;  %906 = vmatpush3.msra.mxu1 %v660_v54  ;;  %v654_v60 = vld [vmem:[%s1316_s4 + $0x40] sm:$0xff]  ;;  %v653_v61 = vld [vmem:[%s1316_s4 + $0x38] sm:$0xff]  ;;  %v652_v62 = vld [vmem:[%s1316_s4 + $0x30] sm:$0xff] }
  0x4b   : > { %520 = vst [vmem:[#allocation4] sm:$0xff] %v519_v40  ;;  %876 = vmatprep.subr.mxu0 %v1027_v35  ;;  %907 = vmatprep.subr.mxu1 %v1027_v35  ;;  %v651_v63 = vld [vmem:[%s1316_s4 + $0x28] sm:$0xff]  ;;  %v650_v0 = vld [vmem:[%s1316_s4 + $0x20] sm:$0xff]  ;;  %v649_v1 = vld [vmem:[%s1316_s4 + $0x18] sm:$0xff] }
  0x4c   : > { %877 = vmatpush3.msra.mxu0 %v532_v41  ;;  %908 = vmatpush3.msra.mxu1 %v659_v55  ;;  %v648_v2 = vld [vmem:[%s1316_s4 + $0x10] sm:$0xff]  ;;  %v647_v3 = vld [vmem:[%s1316_s4 + $0x8] sm:$0xff]  ;;  %v646_v4 = vld [vmem:[%s1316_s4] sm:$0xff] }
  0x4d   : > { %878 = vmatprep.subr.mxu0 %v1027_v35  ;;  %909 = vmatprep.subr.mxu1 %v1027_v35  ;;  %v825_v25 = vld [vmem:[%s1314_s2] ss:$0 sm:$0xff] }
  0x4e   : > { %879 = vmatpush3.msra.mxu0 %v531_v42  ;;  %910 = vmatpush3.msra.mxu1 %v658_v56  ;;  %v826_v27 = vld [vmem:[%s1315_s3] ss:$0 sm:$0xff] }
  0x4f   : > { %880 = vmatprep.subr.mxu0 %v1027_v35  ;;  %911 = vmatprep.subr.mxu1 %v1027_v35  ;;  %v828_v32 = vld [vmem:[%s1318_s6] ss:$0 sm:$0xff] }
  0x50   : > { %881 = vmatpush3.msra.mxu0 %v530_v43  ;;  %912 = vmatpush3.msra.mxu1 %v657_v57  ;;  %v827_v33 = vld [vmem:[%s1317_s5] ss:$0 sm:$0xff] }
  0x51   : > { %882 = vmatprep.subr.mxu0 %v1027_v35  ;;  %913 = vmatprep.subr.mxu1 %v1027_v35 }
  0x52   : > { %883 = vmatpush3.msra.mxu0 %v529_v44  ;;  %914 = vmatpush3.msra.mxu1 %v656_v58 }
  0x53   : > { %884 = vmatprep.subr.mxu0 %v1027_v35  ;;  %915 = vmatprep.subr.mxu1 %v1027_v35 }
  0x54   : > { %885 = vmatpush3.msra.mxu0 %v528_v45  ;;  %916 = vmatpush3.msra.mxu1 %v655_v59 }
  0x55   : > { %886 = vmatprep.subr.mxu0 %v1027_v35  ;;  %917 = vmatprep.subr.mxu1 %v1027_v35 }
  0x56   : > { %887 = vmatpush3.msra.mxu0 %v527_v46  ;;  %918 = vmatpush3.msra.mxu1 %v654_v60 }
  0x57   : > { %888 = vmatprep.subr.mxu0 %v1027_v35  ;;  %919 = vmatprep.subr.mxu1 %v1027_v35 }
  0x58   : > { %889 = vmatpush3.msra.mxu0 %v526_v47  ;;  %920 = vmatpush3.msra.mxu1 %v653_v61 }
  0x59   : > { %890 = vmatprep.subr.mxu0 %v1027_v35  ;;  %921 = vmatprep.subr.mxu1 %v1027_v35 }
  0x5a   : > { %891 = vmatpush3.msra.mxu0 %v525_v48  ;;  %922 = vmatpush3.msra.mxu1 %v652_v62 }
  0x5b   : > { %892 = vmatprep.subr.mxu0 %v1027_v35  ;;  %923 = vmatprep.subr.mxu1 %v1027_v35 }
  0x5c   : > { %893 = vmatpush3.msra.mxu0 %v524_v49  ;;  %924 = vmatpush3.msra.mxu1 %v651_v63 }
  0x5d   : > { %894 = vmatprep.subr.mxu0 %v1027_v35  ;;  %925 = vmatprep.subr.mxu1 %v1027_v35 }
  0x5e   : > { %895 = vmatpush3.msra.mxu0 %v523_v50  ;;  %926 = vmatpush3.msra.mxu1 %v650_v0 }
  0x5f   : > { %896 = vmatprep.subr.mxu0 %v1027_v35  ;;  %927 = vmatprep.subr.mxu1 %v1027_v35 }
  0x60   : > { %897 = vmatpush3.msra.mxu0 %v522_v51  ;;  %928 = vmatpush3.msra.mxu1 %v649_v1 }
  0x61   : > { %898 = vmatprep.subr.mxu0 %v1027_v35  ;;  %929 = vmatprep.subr.mxu1 %v1027_v35 }
  0x62   : > { %899 = vmatpush3.msra.mxu0 %v521_v52  ;;  %930 = vmatpush3.msra.mxu1 %v648_v2 }
  0x63   : > { %901 = vmatmul.mubr.f32.vlgmr.msra.gmra.mxu0 %v519_v40  ;;  %931 = vmatprep.subr.mxu1 %v1027_v35 }
  0x64   : > { %932 = vmatpush3.msra.mxu1 %v647_v3 }
  0x65   : > { %933 = vmatprep.subr.mxu1 %v1027_v35 }
  0x66   : > { %934 = vmatpush3.msra.mxu1 %v646_v4 }
 0x123   : > { %v603_v5 = vpop.f32.mrf.mxu0 }
 0x124   : > { %v607_v6 = vrot.slane %v603_v5, 4 }
 0x125   : > { %v902_v7 = vpop.f32.mrf.mxu0 }
 0x126   : > { %v608_v8 = vadd.f32 %v607_v6, %v603_v5 }
 0x128   : > { %v609_v9 = vrot.slane %v608_v8, 2 }
 0x12a   : > { %v610_v10 = vadd.f32 %v609_v9, %v608_v8 }
 0x12c   : > { %v611_v11 = vrot.slane %v610_v10, 1 }
 0x12e   : > { %v612_v12 = vadd.f32 %v611_v11, %v610_v10 }
 0x130   : > { %v614_v13 = vmul.f32 0.125, %v612_v12 }
 0x132   : > { %v615_v14 = vsub.f32 %v603_v5, %v614_v13 }
 0x134   : > { %v616_v15 = vmul.f32 %v615_v14, %v615_v14 }
 0x136   : > { %v617_v16 = vrot.slane %v616_v15, 4 }
 0x138   : > { %v618_v17 = vadd.f32 %v617_v16, %v616_v15 }
 0x13a   : > { %v619_v18 = vrot.slane %v618_v17, 2 }
 0x13c   : > { %v620_v19 = vadd.f32 %v619_v18, %v618_v17 }
 0x13e   : > { %v621_v20 = vrot.slane %v620_v19, 1 }
 0x140   : > { %v622_v21 = vadd.f32 %v621_v20, %v620_v19 }
 0x142   : > { %v623_v22 = vmul.f32 0.125, %v622_v21 }
 0x144   : > { %v624_v23 = vadd.f32 1e-05, %v623_v22 }
 0x146   : > { %972 = vrsqrt.f32 %v624_v23 }
 0x153   : > { %v973_v24 = vpop.eup %972 }
 0x154   : > { %v626_v26 = vmul.f32 %v973_v24, %v615_v14 }
 0x156   : > { %v634_v28 = vmul.f32 %v825_v25, %v626_v26 }
 0x158   : > { %v642_v29 = vadd.f32 %v826_v27, %v634_v28 }
 0x15a   : > { %936 = vmatmul.mubr.f32.vlgmr.msra.gmra.mxu1 %v642_v29  ;;  %v643_v30 = vmul.f32 %v642_v29, %v642_v29 }
 0x15c   : > { %644 = vadd.xlane.f32.xlu0 %v643_v30 }
 0x1e5   : > { %v645_v31 = vpop.xlane.xlu0 %644 }
 0x1e6   : > { %v746_v35 = vmul.f32 %v828_v32, %v645_v31 }
 0x21a   : > { %v735_v34 = vpop.f32.mrf.mxu1 }
 0x21b   : > { %v736_v36 = vadd.f32 %v827_v33, %v735_v34 }
 0x21c   : > { %v937_v37 = vpop.f32.mrf.mxu1 }
 0x21d   : > { %v747_v38 = vadd.f32 %v746_v35, %v736_v36 }
 0x21f   : > { %748 = vst [vmem:[%s1320_s8] sm:$0xff] %v747_v38  ;;  %v749_v39 = vmul.f32 16.0, %v747_v38 }
 0x221   : > { %750 = vst [vmem:[%s1321_s9] sm:$0xff] %v749_v39 }
 0x222 PF: > { %p942_p10 = scmp.eq.s32.totalorder %s1096_s12, 3  ;;  %s1029_s18 = smov [#allocation4]  }
 0x223   : > { %s758_s19 = sshll.u32 %s1029_s18, 4  ;;  %s759_s19 = int_to_ptr.vmem [resolvable:$true] %s758_s19 }
 0x224   : > { %s974_s20 = scalar_lea.vmem %s759_s19, 128  ;;  %p981_p0 = scmp.lt.s32.totalorder %s759_s19, %s759_s19 }
 0x225   : > { %p975_p11 = scmp.ne.s32.totalorder %s759_s19, %s974_s20  ;;  %p982_p1 = scmp.lt.s32.totalorder %s974_s20, %s974_s20 }
 0x227   : > { %p976_p12 = pnand %p975_p11, %p942_p10  ;;  %p983_p2 = por %p982_p1, %p981_p0 }
 0x229   : > { %p977_p13 = pneg %p976_p12 }
 0x22b   : > { %p984_p3 = pnand %p983_p2, %p977_p13 }
 0x22d   : > { %987 = shalt.err (!%p984_p3)
}
 0x22e   : > { %939 = dma.vmem_to_hbm [thread:$0]  (%p942_p10), %s759_s19, 128, %s1319_s7, [#allocation5]  }
 0x22f   : > { %1011 = dma.done.wait (%p942_p10), [#allocation5], 128  }
 0x230   : > { %1013 = vsyncadd (%p942_p10), [#allocation5], 4294967168 }
 0x231 PF: > { %p18_p4 = scmp.ge.s32.totalorder %s1099_s13, 6   ;;  %s1322_s30 = smov %s1020_s10 }
 0x232   : > { %s1323_s10 = smov %s1108_s16  ;;  %s1324_s11 = smov %s1099_s13 }
 0x233   :  { %20 = sbr.rel (!%p18_p4) target bundleno = 2 (0x2), region = 142 }
 0x238   :  { %783 = vsyncpa [#allocation5], 1 }
 0x239   :  { %785 = vsyncpa [#allocation5 + $0x1], 1 }

</bundles_post_ra>
